<compile_context>
chip_gen: v7x
topology: tpu7x:2x2x1
jax: 0.10.0
libtpu: 0.0.40
codegen_flags: <defaults>
</compile_context>

<pallas_src>
import functools
import math

import jax
import jax.numpy as jnp
from jax import lax
from jax.experimental import pallas as pl
from jax.experimental.pallas import tpu as pltpu


def attention_dropout_kernel(seed_ref, w_ref, o_ref, *, p: float,
                             rows_per_block: int, valid_cols: int):
    # seed_ref: (1,) int32 in SMEM (scalar prefetch, already host-mixed)
    # w_ref:    (TM, Lp) weights tile in VMEM
    # o_ref:    (TM, Lp) output tile in VMEM
    tm, lp = w_ref.shape

    row0 = pl.program_id(0) * rows_per_block
    rows_i32 = row0 + lax.broadcasted_iota(jnp.int32, (tm, lp), 0)
    cols_i32 = lax.broadcasted_iota(jnp.int32, (tm, lp), 1)

    # --- counter-based uniforms: Jenkins 96-bit mix of (row, col, seed). ---
    # Only add / xor / logical-shift on uint32: portable to VPU + interpret.
    a = rows_i32.astype(jnp.uint32) + jnp.uint32(0x9E3779B9)
    b = cols_i32.astype(jnp.uint32) + jnp.uint32(0x85EBCA77)
    c = seed_ref[0].astype(jnp.uint32) + jnp.uint32(0xC2B2AE3D)

    a = a - b; a = a - c; a = a ^ (c >> 13)
    b = b - c; b = b - a; b = b ^ (a << 8)
    c = c - a; c = c - b; c = c ^ (b >> 13)
    a = a - b; a = a - c; a = a ^ (c >> 12)
    b = b - c; b = b - a; b = b ^ (a << 16)
    c = c - a; c = c - b; c = c ^ (b >> 5)
    a = a - b; a = a - c; a = a ^ (c >> 3)
    b = b - c; b = b - a; b = b ^ (a << 10)
    c = c - a; c = c - b; c = c ^ (b >> 15)

    # Low 23 bits -> exact f32 integer in [0, 2^23) -> uniform in [0, 1).
    ps = (c & jnp.uint32(0x7FFFFF)).astype(jnp.int32).astype(jnp.float32)
    ps = ps * jnp.float32(1.0 / (1 << 23))

    if valid_cols < lp:
        # Padded lanes must not raise the per-row max (ps >= 0 always).
        ps = jnp.where(cols_i32 < valid_cols, ps, jnp.float32(0.0))

    maxs = jnp.max(ps, axis=-1, keepdims=True)           # (TM, 1)
    ts = jnp.minimum(maxs, jnp.float32(p))                # (TM, 1)
    # Single vsel; identical to mask * weights for finite weights.
    o_ref[...] = jnp.where(ps >= ts, w_ref[...], jnp.zeros((), o_ref.dtype))


def _round_up(x: int, m: int) -> int:
    return ((x + m - 1) // m) * m


def attention_dropout_forward(weights, *, p: float, seed: int = 0,
                              training: bool = True):
    """Pallas implementation of AttentionDropout.forward.

    weights: any shape (..., L); the dropout threshold is the per-row max of
    the uniform draws over the last dim, clamped to p.
    """
    if (not training) or p <= 0.0:
        # Same fast path as the torch module: identity, no RNG, no kernel.
        return weights

    orig_shape = weights.shape
    L = orig_shape[-1]
    N = math.prod(orig_shape[:-1]) if len(orig_shape) > 1 else 1
    if N == 0 or L == 0:
        return weights
    w2 = weights.reshape(N, L)

    # Lane-dense last dim: pad to a multiple of 128 (unmasked vector stores).
    Lp = _round_up(L, 128)
    if Lp != L:
        w2 = jnp.pad(w2, ((0, 0), (0, Lp - L)))

    itemsize = jnp.dtype(weights.dtype).itemsize
    sub = {4: 8, 2: 16, 1: 32}.get(itemsize, 8)   # native sublane multiple

    # --- tile-row selection from a VMEM byte budget (v7x 64 MiB safe) ---
    # Resident per row: 2x double-buffered in/out tiles (4*itemsize) plus
    # ~4 tile-sized u32/f32 hash temporaries (a, b, c, ps).
    VMEM_BUDGET = 40 * 1024 * 1024
    bytes_per_row = Lp * (4 * itemsize + 4 * 4)
    if N <= sub:
        tm = N                                     # full-dim block is allowed
    else:
        tm = VMEM_BUDGET // bytes_per_row
        tm = max(min(tm, 1024, N), sub)            # ~85% roofline plateau cap
        if tm >= N:
            # Keep >= 2 grid steps so both v7x TensorCores get work.
            tm = _round_up(-(-N // 2), sub)
        tm = max((tm // sub) * sub, sub)
    grid = (pl.cdiv(N, tm),)

    # Explicit scoped-VMEM limit sized from the chosen tile.
    tile_bytes = tm * Lp * itemsize
    vmem_need = 4 * tile_bytes + 4 * tm * Lp * 4 + (2 << 20)
    vmem_limit = int(min(max(vmem_need, 32 << 20), 56 << 20))

    # Host-side seed mixing (strong odd-multiplier) so (seed, tile) streams
    # never collide; kernel randomness then depends only on global (row, col).
    mixed = (int(seed) * 0x9E3779B1 + 0x7F4A7C15) & 0xFFFFFFFF
    if mixed >= 1 << 31:
        mixed -= 1 << 32
    seed_arr = jnp.asarray([mixed], dtype=jnp.int32)

    kernel = functools.partial(attention_dropout_kernel, p=float(p),
                               rows_per_block=tm, valid_cols=L)

    out = pl.pallas_call(
        kernel,
        out_shape=jax.ShapeDtypeStruct((N, Lp), weights.dtype),
        grid_spec=pltpu.PrefetchScalarGridSpec(
            num_scalar_prefetch=1,
            grid=grid,
            in_specs=[pl.BlockSpec((tm, Lp), lambda i, seed_ref: (i, 0))],
            out_specs=pl.BlockSpec((tm, Lp), lambda i, seed_ref: (i, 0)),
        ),
        compiler_params=pltpu.CompilerParams(
            dimension_semantics=("parallel",),
            vmem_limit_bytes=vmem_limit),
    )(seed_arr, w2)

    if Lp != L:
        out = out[:, :L]
    return out.reshape(orig_shape)


if __name__ == "__main__":
    # Attention-weight shaped input: (batch=2, heads=4, q_len=16, k_len=128).
    B, H, SQ, SK = 2, 4, 16, 128
    p = 0.5

    key = jax.random.PRNGKey(0)
    logits = jax.random.normal(key, (B, H, SQ, SK), jnp.float32)
    weights = jax.nn.softmax(logits, axis=-1)   # strictly positive rows

    out = attention_dropout_forward(weights, p=p, seed=1234, training=True)
    out = jax.block_until_ready(out)
    assert out.shape == weights.shape, out.shape

    w_f = weights.reshape(-1, SK)
    o_f = out.reshape(-1, SK)
    kept = o_f == w_f
    zeroed = o_f == 0.0
    # Every element is either kept verbatim (mask==1) or zeroed (mask==0).
    assert bool(jnp.all(kept | zeroed))
    # The per-row argmax of ps always satisfies ps >= min(max, p), so at least
    # one element per row survives.
    assert bool(jnp.all(jnp.any(kept, axis=-1)))
    # With p=0.5 and 128 columns the threshold is ~p, so ~half get dropped.
    drop_frac = float(jnp.mean(zeroed.astype(jnp.float32)))
    assert 0.3 < drop_frac < 0.7, drop_frac
    # Deterministic given the seed (and independent of tiling by construction).
    out2 = attention_dropout_forward(weights, p=p, seed=1234, training=True)
    assert bool(jnp.all(out == jax.block_until_ready(out2)))
    # Eval mode and p == 0 are exact identities (no kernel launch).
    assert bool(jnp.all(attention_dropout_forward(weights, p=p, training=False)
                        == weights))
    assert bool(jnp.all(attention_dropout_forward(weights, p=0.0, training=True)
                        == weights))
    print("KERNEL_OK")
</pallas_src>

<mosaic_0001>
module attributes {stable_mosaic.version = 11 : i64} {
  func.func @attention_dropout_kernel(%arg0: i32, %arg1: memref<1xi32, #tpu.memory_space<smem>>, %arg2: memref<64x128xf32, #tpu.memory_space<vmem>>, %arg3: memref<64x128xf32, #tpu.memory_space<vmem>>) attributes {dimension_semantics = [#tpu.dimension_semantics<parallel>], iteration_bounds = array<i64: 2>, scalar_prefetch = 1 : i64, scratch_operands = 0 : i64, tpu.core_type = #tpu.core_type<tc>, window_params = [{transform_indices = @transform_0, window_bounds = array<i64: 64, 128>}, {transform_indices = @transform_1, window_bounds = array<i64: 64, 128>}]} {
    %c64_i32 = arith.constant 64 : i32
    %0 = arith.muli %arg0, %c64_i32 : i32
    %1 = tpu.iota {dimensions = array<i32: 0>} : vector<64x128xi32>
    %2 = vector.broadcast %0 : i32 to vector<64x128xi32>
    %3 = arith.addi %2, %1 : vector<64x128xi32>
    %4 = tpu.iota {dimensions = array<i32: 1>} : vector<64x128xi32>
    %c-1640531527_i32 = arith.constant -1640531527 : i32
    %5 = vector.broadcast %c-1640531527_i32 : i32 to vector<64x128xi32>
    %6 = arith.addi %3, %5 : vector<64x128xi32>
    %c-2048144777_i32 = arith.constant -2048144777 : i32
    %7 = vector.broadcast %c-2048144777_i32 : i32 to vector<64x128xi32>
    %8 = arith.addi %4, %7 : vector<64x128xi32>
    %c0 = arith.constant 0 : index
    %9 = memref.load %arg1[%c0] : memref<1xi32, #tpu.memory_space<smem>>
    %c-1028477379_i32 = arith.constant -1028477379 : i32
    %10 = arith.addi %9, %c-1028477379_i32 : i32
    %11 = arith.subi %6, %8 : vector<64x128xi32>
    %12 = vector.broadcast %10 : i32 to vector<64x128xi32>
    %13 = arith.subi %11, %12 : vector<64x128xi32>
    %c13_i32 = arith.constant 13 : i32
    %14 = arith.shrui %10, %c13_i32 : i32
    %15 = vector.broadcast %14 : i32 to vector<64x128xi32>
    %16 = arith.xori %13, %15 : vector<64x128xi32>
    %17 = vector.broadcast %10 : i32 to vector<64x128xi32>
    %18 = arith.subi %8, %17 : vector<64x128xi32>
    %19 = arith.subi %18, %16 : vector<64x128xi32>
    %c8_i32 = arith.constant 8 : i32
    %20 = vector.broadcast %c8_i32 : i32 to vector<64x128xi32>
    %21 = arith.shli %16, %20 : vector<64x128xi32>
    %22 = arith.xori %19, %21 : vector<64x128xi32>
    %23 = vector.broadcast %10 : i32 to vector<64x128xi32>
    %24 = arith.subi %23, %16 : vector<64x128xi32>
    %25 = arith.subi %24, %22 : vector<64x128xi32>
    %c13_i32_0 = arith.constant 13 : i32
    %26 = vector.broadcast %c13_i32_0 : i32 to vector<64x128xi32>
    %27 = arith.shrui %22, %26 : vector<64x128xi32>
    %28 = arith.xori %25, %27 : vector<64x128xi32>
    %29 = arith.subi %16, %22 : vector<64x128xi32>
    %30 = arith.subi %29, %28 : vector<64x128xi32>
    %c12_i32 = arith.constant 12 : i32
    %31 = vector.broadcast %c12_i32 : i32 to vector<64x128xi32>
    %32 = arith.shrui %28, %31 : vector<64x128xi32>
    %33 = arith.xori %30, %32 : vector<64x128xi32>
    %34 = arith.subi %22, %28 : vector<64x128xi32>
    %35 = arith.subi %34, %33 : vector<64x128xi32>
    %c16_i32 = arith.constant 16 : i32
    %36 = vector.broadcast %c16_i32 : i32 to vector<64x128xi32>
    %37 = arith.shli %33, %36 : vector<64x128xi32>
    %38 = arith.xori %35, %37 : vector<64x128xi32>
    %39 = arith.subi %28, %33 : vector<64x128xi32>
    %40 = arith.subi %39, %38 : vector<64x128xi32>
    %c5_i32 = arith.constant 5 : i32
    %41 = vector.broadcast %c5_i32 : i32 to vector<64x128xi32>
    %42 = arith.shrui %38, %41 : vector<64x128xi32>
    %43 = arith.xori %40, %42 : vector<64x128xi32>
    %44 = arith.subi %33, %38 : vector<64x128xi32>
    %45 = arith.subi %44, %43 : vector<64x128xi32>
    %c3_i32 = arith.constant 3 : i32
    %46 = vector.broadcast %c3_i32 : i32 to vector<64x128xi32>
    %47 = arith.shrui %43, %46 : vector<64x128xi32>
    %48 = arith.xori %45, %47 : vector<64x128xi32>
    %49 = arith.subi %38, %43 : vector<64x128xi32>
    %50 = arith.subi %49, %48 : vector<64x128xi32>
    %c10_i32 = arith.constant 10 : i32
    %51 = vector.broadcast %c10_i32 : i32 to vector<64x128xi32>
    %52 = arith.shli %48, %51 : vector<64x128xi32>
    %53 = arith.xori %50, %52 : vector<64x128xi32>
    %54 = arith.subi %43, %48 : vector<64x128xi32>
    %55 = arith.subi %54, %53 : vector<64x128xi32>
    %c15_i32 = arith.constant 15 : i32
    %56 = vector.broadcast %c15_i32 : i32 to vector<64x128xi32>
    %57 = arith.shrui %53, %56 : vector<64x128xi32>
    %58 = arith.xori %55, %57 : vector<64x128xi32>
    %c8388607_i32 = arith.constant 8388607 : i32
    %59 = vector.broadcast %c8388607_i32 : i32 to vector<64x128xi32>
    %60 = arith.andi %58, %59 : vector<64x128xi32>
    %61 = arith.sitofp %60 : vector<64x128xi32> to vector<64x128xf32>
    %cst = arith.constant 1.1920929E-7 : f32
    %62 = vector.broadcast %cst : f32 to vector<64x128xf32>
    %63 = arith.mulf %61, %62 : vector<64x128xf32>
    %cst_1 = arith.constant dense<0xFF800000> : vector<64xf32>
    %64 = vector.multi_reduction <maximumf>, %63, %cst_1 [1] : vector<64x128xf32> to vector<64xf32>
    %65 = vector.shape_cast %64 : vector<64xf32> to vector<64x1xf32>
    %cst_2 = arith.constant 5.000000e-01 : f32
    %66 = vector.broadcast %cst_2 : f32 to vector<64x1xf32>
    %67 = arith.minimumf %65, %66 : vector<64x1xf32>
    %68 = vector.broadcast %67 : vector<64x1xf32> to vector<64x128xf32>
    %69 = arith.cmpf oge, %63, %68 : vector<64x128xf32>
    %c0_3 = arith.constant 0 : index
    %c0_4 = arith.constant 0 : index
    %70 = vector.load %arg2[%c0_3, %c0_4] : memref<64x128xf32, #tpu.memory_space<vmem>>, vector<64x128xf32>
    %cst_5 = arith.constant 0.000000e+00 : f32
    %71 = vector.broadcast %cst_5 : f32 to vector<64x128xf32>
    %72 = arith.select %69, %70, %71 : vector<64x128xi1>, vector<64x128xf32>
    %c0_6 = arith.constant 0 : index
    %c0_7 = arith.constant 0 : index
    %73 = vector.load %arg3[%c0_6, %c0_7] : memref<64x128xf32, #tpu.memory_space<vmem>>, vector<64x128xf32>
    tpu.vector_store %arg3[%c0_6, %c0_7], %72 {strides = array<i32>} : memref<64x128xf32, #tpu.memory_space<vmem>>, vector<64x128xf32>,
    return
  }
  func.func @transform_0(%arg0: i32, %arg1: memref<1xi32, #tpu.memory_space<smem>>) -> (i32, i32) {
    %c0_i32 = arith.constant 0 : i32
    %c0_i32_0 = arith.constant 0 : i32
    return %arg0, %c0_i32 : i32, i32
  }
  func.func @transform_1(%arg0: i32, %arg1: memref<1xi32, #tpu.memory_space<smem>>) -> (i32, i32) {
    %c0_i32 = arith.constant 0 : i32
    %c0_i32_0 = arith.constant 0 : i32
    return %arg0, %c0_i32 : i32, i32
  }
}

</mosaic_0001>

<bundles_post_ra>
// kernel: tpu_custom_call.1
= control target key start
LH: loop header
LB: loop body
LE: loop exit
PB: predicated region body
PF: predicated region fallthrough
CT: control target
= control target key end

     0   :  { %s1078_s0 = inlined_call_operand.<no memory space> [shape: s32[1], index: 0, kind: input, shape index: {}]   ;;  %s1079_s1 = inlined_call_operand.hbm [shape: f32[128,128], index: 1, kind: input, shape index: {}]   ;;  %s1080_s2 = inlined_call_operand.hbm [shape: f32[128,128], index: 2, kind: output, shape index: {}]  }
   0x1   :  { %7 = sst [smem:[#allocation3]] %s1078_s0 }
   0x2   :  { %8 = vsyncpa [#allocation5], 0 }
   0x3   :  { %10 = vsyncpa [#allocation5 + $0x1], 0 }
   0x4   :  { %11 = vsyncpa [#allocation6], 0 }
   0x5   :  { %13 = vsyncpa [#allocation6 + $0x1], 0  ;;  %s803_s11 = smov 0   ;;  %s805_s12 = smov 0  }
   0x6   :  { %s807_s13 = smov 0   ;;  %s809_s14 = smov 0  }
   0x7 LB: > { %s824_s0 = sadd.s32 4294967295, %s777_s14   ;;  %s614_s15 = sadd.s32 4294967294, %s777_s14   ;;  %s777_s14 = sphi %s809_s14, %s1093_s14   ;;  %s773_s13 = sphi %s807_s13, %s1092_s13   ;;  %s769_s12 = sphi %s805_s12, %s1091_s12   ;;  %s765_s11 = sphi %s803_s11, %s1090_s11  }
   0x8   : > { %s828_s16 = sadd.s32 1, %s777_s14   ;;  %s26_s17 = sadd.s32 1, %s773_s13 }
   0x9   : > { %s23_s18 = ssub.s32 %s777_s14, %s828_s16  ;;  %p33_p0 = scmp.ne.s32.totalorder %s773_s13, %s769_s12 }
   0xa   : > { %p24_p1 = scmp.eq.s32.totalorder %s23_s18, 0  ;;  %p34_p2 = scmp.eq.s32.totalorder %s777_s14, 0 }
   0xb   : > { %p39_p3 = scmp.ne.s32.totalorder %s769_s12, %s765_s11  ;;  %p40_p4 = scmp.eq.s32.totalorder %s824_s0, 0 }
   0xc   : > { %s840_s19 = scalar_select %p24_p1, %s773_s13, %s26_s17  }
   0xd   : > { %p842_p5 = por %p34_p2, %p33_p0  ;;  %p846_p6 = por %p40_p4, %p39_p3 }
   0xe   : > { %p63_p7 = scmp.eq.s32.totalorder %s824_s0, 1  ;;  %p69_p8 = scmp.eq.s32.totalorder %s614_s15, 1 }
   0xf   : > { %p643_p10 = scmp.lt.s32.totalorder %s777_s14, 2  ;;  %s89_s24 = sand.u32 1, %s773_s13  }
  0x10   : > { %p853_p11 = por %p63_p7, %p33_p0  ;;  %p857_p12 = por %p69_p8, %p39_p3 }
  0x11   : > { %s629_s25 = sshll.u32 %s777_s14, 10  ;;  %s617_s26 = sshll.u32 %s89_s24, 6 }
  0x12   : > { %s1084_s22 = scalar_select %p853_p11, 1, 0 }
  0x13   : > { %s1085_s23 = scalar_select %p857_p12, 1, 0 }
  0x14   : > { %s866_s29 = scalar_lea.hbm %s1079_s1, %s629_s25  ;;  %s93_s30 = scalar_lea.vmem [#allocation4], %s617_s26 }
  0x15   : > { %s100_s3 = sshll.u32 %s93_s30, 4  ;;  %p870_p13 = pnand %p643_p10, %p842_p5  ;;  %s874_s3 = int_to_ptr.vmem [resolvable:$true] %s100_s3 }
  0x16   : > { %s876_s5 = scalar_lea.sflag [#allocation5], %s89_s24  ;;  %s681_s6 = scalar_lea.hbm %s866_s29, 1024 }
  0x17   : > { %p682_p0 = scmp.ne.s32.totalorder %s866_s29, %s681_s6  ;;  %p683_p1 = pneg %p870_p13 }
  0x18   : > { %s686_s9 = scalar_lea.hbm %s1079_s1, 2048  ;;  %p687_p4 = scmp.lt.u32.totalorder %s866_s29, %s1079_s1 }
  0x19   : > { %p684_p2 = pnand %p683_p1, %p682_p0  ;;  %p688_p5 = scmp.lt.u32.totalorder %s686_s9, %s681_s6 }
  0x1a   : > { %p690_p8 = scmp.lt.u32.totalorder %s681_s6, %s866_s29 }
  0x1b   : > { %p685_p3 = pneg %p684_p2  ;;  %p689_p7 = por %p688_p5, %p687_p4 }
  0x1d   : > { %p691_p10 = por %p690_p8, %p689_p7 }
  0x1f   : > { %p692_p9 = pnand %p691_p10, %p685_p3 }
  0x21   : > { %695 = shalt.err (!%p692_p9)
}
  0x22   : > { %s696_s17 = scalar_lea.vmem %s874_s3, 1024  ;;  %s779_s18 = smov [#allocation4]  }
  0x23   : > { %p697_p0 = scmp.ne.s32.totalorder %s874_s3, %s696_s17  ;;  %s701_s20 = sshll.u32 %s779_s18, 4  ;;  %s702_s20 = int_to_ptr.vmem [resolvable:$false] %s701_s20 }
  0x24   : > { %s703_s24 = scalar_lea.vmem %s702_s20, 2048  ;;  %p704_p11 = scmp.lt.s32.totalorder %s874_s3, %s702_s20 }
  0x25   : > { %p699_p2 = pnand %p697_p0, %p683_p1  ;;  %p705_p4 = scmp.lt.s32.totalorder %s703_s24, %s696_s17 }
  0x27   : > { %p700_p12 = pneg %p699_p2  ;;  %p706_p5 = por %p705_p4, %p704_p11 }
  0x29   : > { %p707_p7 = pnand %p706_p5, %p700_p12 }
  0x2b   : > { %710 = shalt.err (!%p707_p7)
}
  0x2c   : > { %s780_s25 = smov 128   ;;  %s781_s26 = smov 8  }
  0x2d   : > { %638 = dma.hbm_to_vmem [thread:$0]  (!%p870_p13), %s866_s29, 1024, %s874_s3, %s876_s5, %s780_s25, %s780_s25, %s781_s26  }
  0x2e   : > { %p620_p9 = scmp.ge.s32.totalorder %s777_s14, 1  ;;  %p108_p1 = scmp.lt.s32.totalorder %s777_s14, 3 }
  0x30   : > { %p109_p3 = pnand %p620_p9, %p108_p1 }
  0x31   : > { %s907_s27 = sand.u32 (!%p109_p3), 1, %s769_s12  }
  0x32   : > { %112 = sbr.rel (%p109_p3) target bundleno = 318 (0x13e), region = 24  ;;  %s621_s28 = sshll.u32 (!%p109_p3), %s907_s27, 6 }
  0x33   : > { %s115_s30 = scalar_lea.sflag (!%p109_p3), [#allocation5], %s907_s27  ;;  %s913_s6 = scalar_lea.vmem (!%p109_p3), [#allocation4], %s621_s28 }
  0x39   : > { %756 = dma.done.wait (%p846_p6), %s115_s30, 1024  }
  0x3a   : > { %758 = vsyncadd (%p846_p6), %s115_s30, 4294966272  ;;  %s623_s29 = sshll.u32 %s824_s0, 6  ;;  %v140_v0 = vlaneseq  ;;  %s169_s3 = sld [smem:[#allocation3]] }
  0x3b   : > { %v149_v1 = vstv %s623_s29  ;;  %s1009_s5 = scalar_lea.vmem [#allocation7], %s621_s28  ;;  %s630_s8 = sshll.u32 %s824_s0, 10 }
  0x3c   : > { %v141_v2 = vshrl.u32 %v140_v0, 7  ;;  %v159_v3 = vand.u32 127, %v140_v0  ;;  %s541_s7 = sshll.u32 %s1009_s5, 4  ;;  %s1033_s15 = scalar_lea.hbm %s1080_s2, %s630_s8  ;;  %s1027_s7 = int_to_ptr.vmem [resolvable:$true] %s541_s7 }
  0x3d   : > { %s528_s17 = scalar_lea.sflag [#allocation6], %s907_s27  ;;  %s711_s18 = scalar_lea.vmem %s1027_s7, 1024 }
  0x3e   : > { %v143_v4 = vadd.s32 16, %v141_v2  ;;  %v920_v5 = vadd.s32 2246822519, %v159_v3  ;;  %v150_v6 = vadd.s32 %v149_v1, %v141_v2  ;;  %v144_v7 = vadd.s32 24, %v141_v2  ;;  %p712_p6 = scmp.ne.s32.totalorder %s1027_s7, %s711_s18  ;;  %p1087_p11 = scmp.ne.s32.totalorder %s1084_s22, 0 }
  0x3f   : > { %v142_v8 = vadd.s32 8, %v141_v2  ;;  %v146_v9 = vadd.s32 40, %v141_v2  ;;  %v145_v10 = vadd.s32 32, %v141_v2  ;;  %v148_v11 = vadd.s32 56, %v141_v2  ;;  %s782_s0 = smov [#allocation7]  }
  0x40   : > { %v152_v12 = vadd.s32 %v149_v1, %v143_v4  ;;  %v160_v13 = vadd.s32 2654435769, %v150_v6  ;;  %v153_v14 = vadd.s32 %v149_v1, %v144_v7  ;;  %v147_v15 = vadd.s32 48, %v141_v2  ;;  %s170_s21 = sadd.s32 3266489917, %s169_s3  ;;  %p713_p12 = pnand %p712_p6, %p1087_p11 }
  0x41   : > { %v151_v16 = vadd.s32 %v149_v1, %v142_v8  ;;  %v155_v17 = vadd.s32 %v149_v1, %v146_v9  ;;  %v154_v18 = vadd.s32 %v149_v1, %v145_v10  ;;  %v157_v19 = vadd.s32 %v149_v1, %v148_v11  ;;  %s188_s4 = sshrl.u32 %s170_s21, 13  ;;  %s715_s20 = sshll.u32 %s782_s0, 4  ;;  %s716_s20 = int_to_ptr.vmem [resolvable:$false] %s715_s20 }
  0x42   : > { %v162_v20 = vadd.s32 2654435769, %v152_v12  ;;  %v922_v21 = vstv %s170_s21  ;;  %v171_v22 = vsub.s32 %v160_v13, %v920_v5  ;;  %v163_v23 = vadd.s32 2654435769, %v153_v14  ;;  %p714_p13 = pneg %p713_p12  ;;  %s717_s24 = scalar_lea.vmem %s716_s20, 2048 }
  0x43   : > { %v925_v24 = vstv %s188_s4  ;;  %v929_v25 = vsub.s32 %v920_v5, %v922_v21  ;;  %v161_v26 = vadd.s32 2654435769, %v151_v16  ;;  %v165_v27 = vadd.s32 2654435769, %v155_v17  ;;  %p718_p8 = scmp.lt.s32.totalorder %s1027_s7, %s716_s20  ;;  %p719_p10 = scmp.lt.s32.totalorder %s717_s24, %s711_s18 }
  0x44   : > { %v173_v28 = vsub.s32 %v162_v20, %v920_v5  ;;  %v180_v29 = vsub.s32 %v171_v22, %v922_v21  ;;  %v174_v30 = vsub.s32 %v163_v23, %v920_v5  ;;  %v164_v31 = vadd.s32 2654435769, %v154_v18 }
  0x45   : > { %v172_v32 = vsub.s32 %v161_v26, %v920_v5  ;;  %v176_v33 = vsub.s32 %v165_v27, %v920_v5  ;;  %v936_v34 = vadd.s32 2654435769, %v157_v19  ;;  %v156_v35 = vadd.s32 %v149_v1, %v147_v15  ;;  %p720_p0 = por %p719_p10, %p718_p8 }
  0x46   : > { %v182_v36 = vsub.s32 %v173_v28, %v922_v21  ;;  %v190_v37 = vxor.u32 %v925_v24, %v180_v29  ;;  %v183_v38 = vsub.s32 %v174_v30, %v922_v21  ;;  %v175_v39 = vsub.s32 %v164_v31, %v920_v5 }
  0x47   : > { %v181_v40 = vsub.s32 %v172_v32, %v922_v21  ;;  %v185_v41 = vsub.s32 %v176_v33, %v922_v21  ;;  %v178_v42 = vsub.s32 %v936_v34, %v920_v5  ;;  %v946_v43 = vadd.s32 2654435769, %v156_v35  ;;  %p721_p2 = pnand %p720_p0, %p714_p13 }
  0x48   : > { %v192_v44 = vxor.u32 %v925_v24, %v182_v36  ;;  %v199_v45 = vsub.s32 %v929_v25, %v190_v37  ;;  %v207_v46 = vshll.u32 %v190_v37, 8  ;;  %v223_v47 = vsub.s32 %v922_v21, %v190_v37 }
  0x49   : > { %v193_v48 = vxor.u32 %v925_v24, %v183_v38  ;;  %v191_v49 = vxor.u32 %v925_v24, %v181_v40  ;;  %v954_v50 = vxor.u32 %v925_v24, %v185_v41  ;;  %v957_v51 = vsub.s32 %v175_v39, %v922_v21 }
  0x4a   : > { %v201_v52 = vsub.s32 %v929_v25, %v192_v44  ;;  %v209_v53 = vshll.u32 %v192_v44, 8  ;;  %v225_v54 = vsub.s32 %v922_v21, %v192_v44  ;;  %v215_v55 = vxor.u32 %v207_v46, %v199_v45 }
  0x4b   : > { %v202_v56 = vsub.s32 %v929_v25, %v193_v48  ;;  %v210_v57 = vshll.u32 %v193_v48, 8  ;;  %v226_v58 = vsub.s32 %v922_v21, %v193_v48  ;;  %v200_v59 = vsub.s32 %v929_v25, %v191_v49 }
  0x4c   : > { %v217_v60 = vxor.u32 %v209_v53, %v201_v52  ;;  %v231_v61 = vsub.s32 %v223_v47, %v215_v55  ;;  %v239_v62 = vshrl.u32 %v215_v55, 13  ;;  %v255_v63 = vsub.s32 %v190_v37, %v215_v55 }
  0x4d   : > { %v218_v0 = vxor.u32 %v210_v57, %v202_v56  ;;  %v208_v1 = vshll.u32 %v191_v49, 8  ;;  %v224_v2 = vsub.s32 %v922_v21, %v191_v49  ;;  %v204_v3 = vsub.s32 %v929_v25, %v954_v50 }
  0x4e   : > { %v233_v4 = vsub.s32 %v225_v54, %v217_v60  ;;  %v241_v6 = vshrl.u32 %v217_v60, 13  ;;  %v257_v7 = vsub.s32 %v192_v44, %v217_v60  ;;  %v247_v8 = vxor.u32 %v239_v62, %v231_v61 }
  0x4f   : > { %v234_v9 = vsub.s32 %v226_v58, %v218_v0  ;;  %v242_v10 = vshrl.u32 %v218_v0, 13  ;;  %v258_v11 = vsub.s32 %v193_v48, %v218_v0  ;;  %v216_v12 = vxor.u32 %v208_v1, %v200_v59 }
  0x50   : > { %v249_v13 = vxor.u32 %v241_v6, %v233_v4  ;;  %v263_v14 = vsub.s32 %v255_v63, %v247_v8  ;;  %v271_v15 = vshrl.u32 %v247_v8, 12  ;;  %v287_v16 = vsub.s32 %v215_v55, %v247_v8 }
  0x51   : > { %v250_v17 = vxor.u32 %v242_v10, %v234_v9  ;;  %v232_v18 = vsub.s32 %v224_v2, %v216_v12  ;;  %v240_v19 = vshrl.u32 %v216_v12, 13  ;;  %v256_v20 = vsub.s32 %v191_v49, %v216_v12 }
  0x52   : > { %v265_v22 = vsub.s32 %v257_v7, %v249_v13  ;;  %v273_v23 = vshrl.u32 %v249_v13, 12  ;;  %v289_v26 = vsub.s32 %v217_v60, %v249_v13  ;;  %v279_v27 = vxor.u32 %v271_v15, %v263_v14 }
  0x53   : > { %v266_v28 = vsub.s32 %v258_v11, %v250_v17  ;;  %v274_v29 = vshrl.u32 %v250_v17, 12  ;;  %v290_v30 = vsub.s32 %v218_v0, %v250_v17  ;;  %v248_v31 = vxor.u32 %v240_v19, %v232_v18 }
  0x54   : > { %v281_v32 = vxor.u32 %v273_v23, %v265_v22  ;;  %v295_v33 = vsub.s32 %v287_v16, %v279_v27  ;;  %v303_v35 = vshll.u32 %v279_v27, 16  ;;  %v319_v36 = vsub.s32 %v247_v8, %v279_v27 }
  0x55   : > { %v282_v37 = vxor.u32 %v274_v29, %v266_v28  ;;  %v264_v38 = vsub.s32 %v256_v20, %v248_v31  ;;  %v272_v39 = vshrl.u32 %v248_v31, 12  ;;  %v288_v40 = vsub.s32 %v216_v12, %v248_v31 }
  0x56   : > { %v297_v41 = vsub.s32 %v289_v26, %v281_v32  ;;  %v305_v44 = vshll.u32 %v281_v32, 16  ;;  %v321_v45 = vsub.s32 %v249_v13, %v281_v32  ;;  %v311_v46 = vxor.u32 %v303_v35, %v295_v33 }
  0x57   : > { %v298_v47 = vsub.s32 %v290_v30, %v282_v37  ;;  %v306_v48 = vshll.u32 %v282_v37, 16  ;;  %v322_v49 = vsub.s32 %v250_v17, %v282_v37  ;;  %v280_v52 = vxor.u32 %v272_v39, %v264_v38 }
  0x58   : > { %v313_v53 = vxor.u32 %v305_v44, %v297_v41  ;;  %v327_v54 = vsub.s32 %v319_v36, %v311_v46  ;;  %v335_v55 = vshrl.u32 %v311_v46, 5  ;;  %v351_v56 = vsub.s32 %v279_v27, %v311_v46 }
  0x59   : > { %v314_v57 = vxor.u32 %v306_v48, %v298_v47  ;;  %v296_v58 = vsub.s32 %v288_v40, %v280_v52  ;;  %v304_v59 = vshll.u32 %v280_v52, 16  ;;  %v320_v60 = vsub.s32 %v248_v31, %v280_v52 }
  0x5a   : > { %v329_v61 = vsub.s32 %v321_v45, %v313_v53  ;;  %v337_v62 = vshrl.u32 %v313_v53, 5  ;;  %v353_v63 = vsub.s32 %v281_v32, %v313_v53  ;;  %v343_v0 = vxor.u32 %v335_v55, %v327_v54 }
  0x5b   : > { %v330_v1 = vsub.s32 %v322_v49, %v314_v57  ;;  %v338_v2 = vshrl.u32 %v314_v57, 5  ;;  %v354_v4 = vsub.s32 %v282_v37, %v314_v57  ;;  %v312_v6 = vxor.u32 %v304_v59, %v296_v58 }
  0x5c   : > { %v345_v7 = vxor.u32 %v337_v62, %v329_v61  ;;  %v359_v8 = vsub.s32 %v351_v56, %v343_v0  ;;  %v367_v9 = vshrl.u32 %v343_v0, 3  ;;  %v383_v10 = vsub.s32 %v311_v46, %v343_v0 }
  0x5d   : > { %v346_v11 = vxor.u32 %v338_v2, %v330_v1  ;;  %v328_v12 = vsub.s32 %v320_v60, %v312_v6  ;;  %v336_v13 = vshrl.u32 %v312_v6, 5  ;;  %v352_v14 = vsub.s32 %v280_v52, %v312_v6 }
  0x5e   : > { %v361_v15 = vsub.s32 %v353_v63, %v345_v7  ;;  %v369_v16 = vshrl.u32 %v345_v7, 3  ;;  %v385_v17 = vsub.s32 %v313_v53, %v345_v7  ;;  %v375_v18 = vxor.u32 %v367_v9, %v359_v8 }
  0x5f   : > { %v362_v19 = vsub.s32 %v354_v4, %v346_v11  ;;  %v370_v20 = vshrl.u32 %v346_v11, 3  ;;  %v386_v22 = vsub.s32 %v314_v57, %v346_v11  ;;  %v344_v23 = vxor.u32 %v336_v13, %v328_v12 }
  0x60   : > { %v377_v26 = vxor.u32 %v369_v16, %v361_v15  ;;  %v391_v27 = vsub.s32 %v383_v10, %v375_v18  ;;  %v399_v28 = vshll.u32 %v375_v18, 10  ;;  %v415_v29 = vsub.s32 %v343_v0, %v375_v18 }
  0x61   : > { %v378_v30 = vxor.u32 %v370_v20, %v362_v19  ;;  %v360_v31 = vsub.s32 %v352_v14, %v344_v23  ;;  %v368_v32 = vshrl.u32 %v344_v23, 3  ;;  %v384_v33 = vsub.s32 %v312_v6, %v344_v23 }
  0x62   : > { %v393_v35 = vsub.s32 %v385_v17, %v377_v26  ;;  %v401_v36 = vshll.u32 %v377_v26, 10  ;;  %v417_v37 = vsub.s32 %v345_v7, %v377_v26  ;;  %v407_v38 = vxor.u32 %v399_v28, %v391_v27 }
  0x63   : > { %v394_v39 = vsub.s32 %v386_v22, %v378_v30  ;;  %v402_v40 = vshll.u32 %v378_v30, 10  ;;  %v418_v41 = vsub.s32 %v346_v11, %v378_v30  ;;  %v376_v44 = vxor.u32 %v368_v32, %v360_v31 }
  0x64   : > { %v409_v45 = vxor.u32 %v401_v36, %v393_v35  ;;  %v423_v46 = vsub.s32 %v415_v29, %v407_v38  ;;  %v431_v47 = vshrl.u32 %v407_v38, 15  ;;  %v212_v48 = vshll.u32 %v954_v50, 8 }
  0x65   : > { %v410_v49 = vxor.u32 %v402_v40, %v394_v39  ;;  %v392_v52 = vsub.s32 %v384_v33, %v376_v44  ;;  %v400_v53 = vshll.u32 %v376_v44, 10  ;;  %v416_v54 = vsub.s32 %v344_v23, %v376_v44 }
  0x66   : > { %v425_v55 = vsub.s32 %v417_v37, %v409_v45  ;;  %v433_v56 = vshrl.u32 %v409_v45, 15  ;;  %v439_v57 = vxor.u32 %v431_v47, %v423_v46  ;;  %v220_v58 = vxor.u32 %v212_v48, %v204_v3 }
  0x67   : > { %v426_v59 = vsub.s32 %v418_v41, %v410_v49  ;;  %v434_v60 = vshrl.u32 %v410_v49, 15  ;;  %v408_v61 = vxor.u32 %v400_v53, %v392_v52  ;;  %v228_v62 = vsub.s32 %v922_v21, %v954_v50 }
  0x68   : > { %v441_v63 = vxor.u32 %v433_v56, %v425_v55  ;;  %v447_v0 = vand.u32 8388607, %v439_v57  ;;  %v244_v1 = vshrl.u32 %v220_v58, 13  ;;  %v260_v2 = vsub.s32 %v954_v50, %v220_v58 }
  0x69   : > { %v442_v4 = vxor.u32 %v434_v60, %v426_v59  ;;  %v424_v6 = vsub.s32 %v416_v54, %v408_v61  ;;  %v432_v7 = vshrl.u32 %v408_v61, 15  ;;  %v236_v8 = vsub.s32 %v228_v62, %v220_v58 }
  0x6a   : > { %v449_v9 = vand.u32 8388607, %v441_v63  ;;  %v455_v10 = vcvt.s32.f32 %v447_v0  ;;  %v194_v3 = vxor.u32 %v925_v24, %v957_v51  ;;  %v187_v11 = vsub.s32 %v178_v42, %v922_v21 }
  0x6b   : > { %v450_v12 = vand.u32 8388607, %v442_v4  ;;  %v440_v13 = vxor.u32 %v432_v7, %v424_v6  ;;  %v252_v14 = vxor.u32 %v244_v1, %v236_v8  ;;  %v177_v50 = vsub.s32 %v946_v43, %v920_v5 }
  0x6c   : > { %v457_v15 = vcvt.s32.f32 %v449_v9  ;;  %v982_v16 = vmul.f32 1.1920929e-07, %v455_v10  ;;  %v203_v17 = vsub.s32 %v929_v25, %v194_v3  ;;  %v211_v18 = vshll.u32 %v194_v3, 8 }
  0x6d   : > { %v458_v19 = vcvt.s32.f32 %v450_v12  ;;  %v448_v20 = vand.u32 8388607, %v440_v13  ;;  %v268_v51 = vsub.s32 %v260_v2, %v252_v14  ;;  %v276_v22 = vshrl.u32 %v252_v14, 12 }
  0x6e   : > { %v985_v23 = vmul.f32 1.1920929e-07, %v457_v15  ;;  %471 = vmax.xlane.f32.xlu0 %v982_v16  ;;  %v292_v34 = vsub.s32 %v220_v58, %v252_v14  ;;  %v219_v42 = vxor.u32 %v211_v18, %v203_v17  ;;  %v227_v26 = vsub.s32 %v922_v21, %v194_v3 }
  0x6f   : > { %v989_v27 = vmul.f32 1.1920929e-07, %v458_v19  ;;  %v456_v5 = vcvt.s32.f32 %v448_v20  ;;  %v284_v43 = vxor.u32 %v276_v22, %v268_v51  ;;  %v197_v28 = vxor.u32 %v925_v24, %v187_v11 }
  0x70   : > { %475 = vmax.xlane.f32.xlu1 %v985_v23  ;;  %v235_v29 = vsub.s32 %v227_v26, %v219_v42  ;;  %v243_v30 = vshrl.u32 %v219_v42, 13  ;;  %v259_v31 = vsub.s32 %v194_v3, %v219_v42  ;;  %v186_v32 = vsub.s32 %v177_v50, %v922_v21 }
  0x71   : > { %v994_v33 = vmul.f32 1.1920929e-07, %v456_v5  ;;  %v300_v35 = vsub.s32 %v292_v34, %v284_v43  ;;  %v308_v36 = vshll.u32 %v284_v43, 16  ;;  %v324_v37 = vsub.s32 %v252_v14, %v284_v43 }
  0x72   : > { %v251_v38 = vxor.u32 %v243_v30, %v235_v29  ;;  %v206_v39 = vsub.s32 %v929_v25, %v197_v28  ;;  %v214_v40 = vshll.u32 %v197_v28, 8  ;;  %v230_v41 = vsub.s32 %v922_v21, %v197_v28 }
  0x73   : > { %473 = vmax.xlane.f32.xlu0 %v994_v33  ;;  %v316_v44 = vxor.u32 %v308_v36, %v300_v35  ;;  %v196_v45 = vxor.u32 %v925_v24, %v186_v32 }
  0x74   : > { %477 = vmax.xlane.f32.xlu1 %v989_v27  ;;  %v267_v46 = vsub.s32 %v259_v31, %v251_v38  ;;  %v275_v47 = vshrl.u32 %v251_v38, 12  ;;  %v291_v48 = vsub.s32 %v219_v42, %v251_v38  ;;  %v222_v49 = vxor.u32 %v214_v40, %v206_v39 }
  0x75   : > { %v332_v52 = vsub.s32 %v324_v37, %v316_v44  ;;  %v340_v53 = vshrl.u32 %v316_v44, 5  ;;  %v356_v54 = vsub.s32 %v284_v43, %v316_v44  ;;  %v205_v55 = vsub.s32 %v929_v25, %v196_v45 }
  0x76   : > { %v283_v56 = vxor.u32 %v275_v47, %v267_v46  ;;  %v238_v57 = vsub.s32 %v230_v41, %v222_v49  ;;  %v246_v58 = vshrl.u32 %v222_v49, 13  ;;  %v262_v59 = vsub.s32 %v197_v28, %v222_v49 }
  0x77   : > { %v348_v60 = vxor.u32 %v340_v53, %v332_v52  ;;  %v213_v61 = vshll.u32 %v196_v45, 8  ;;  %v229_v62 = vsub.s32 %v922_v21, %v196_v45 }
  0x78   : > { %v299_v24 = vsub.s32 %v291_v48, %v283_v56  ;;  %v307_v63 = vshll.u32 %v283_v56, 16  ;;  %v323_v0 = vsub.s32 %v251_v38, %v283_v56  ;;  %v254_v1 = vxor.u32 %v246_v58, %v238_v57 }
  0x79   : > { %v364_v2 = vsub.s32 %v356_v54, %v348_v60  ;;  %v372_v4 = vshrl.u32 %v348_v60, 3  ;;  %v388_v6 = vsub.s32 %v316_v44, %v348_v60  ;;  %v221_v7 = vxor.u32 %v213_v61, %v205_v55 }
  0x7a   : > { %v315_v8 = vxor.u32 %v307_v63, %v299_v24  ;;  %v270_v9 = vsub.s32 %v262_v59, %v254_v1  ;;  %v278_v10 = vshrl.u32 %v254_v1, 12  ;;  %v294_v25 = vsub.s32 %v222_v49, %v254_v1 }
  0x7b   : > { %v380_v3 = vxor.u32 %v372_v4, %v364_v2  ;;  %v237_v11 = vsub.s32 %v229_v62, %v221_v7  ;;  %v245_v12 = vshrl.u32 %v221_v7, 13  ;;  %v261_v13 = vsub.s32 %v196_v45, %v221_v7 }
  0x7c   : > { %v331_v14 = vsub.s32 %v323_v0, %v315_v8  ;;  %v339_v50 = vshrl.u32 %v315_v8, 5  ;;  %v355_v15 = vsub.s32 %v283_v56, %v315_v8  ;;  %v286_v21 = vxor.u32 %v278_v10, %v270_v9 }
  0x7d   : > { %v396_v17 = vsub.s32 %v388_v6, %v380_v3  ;;  %v404_v18 = vshll.u32 %v380_v3, 10  ;;  %v420_v19 = vsub.s32 %v348_v60, %v380_v3  ;;  %v253_v20 = vxor.u32 %v245_v12, %v237_v11 }
  0x7e   : > { %v347_v51 = vxor.u32 %v339_v50, %v331_v14  ;;  %v302_v22 = vsub.s32 %v294_v25, %v286_v21  ;;  %v310_v34 = vshll.u32 %v286_v21, 16  ;;  %v326_v42 = vsub.s32 %v254_v1, %v286_v21 }
  0x7f   : > { %v412_v26 = vxor.u32 %v404_v18, %v396_v17  ;;  %v269_v5 = vsub.s32 %v261_v13, %v253_v20  ;;  %v277_v43 = vshrl.u32 %v253_v20, 12  ;;  %v293_v28 = vsub.s32 %v221_v7, %v253_v20 }
  0x80   : > { %v363_v29 = vsub.s32 %v355_v15, %v347_v51  ;;  %v371_v30 = vshrl.u32 %v347_v51, 3  ;;  %v387_v31 = vsub.s32 %v315_v8, %v347_v51  ;;  %v318_v32 = vxor.u32 %v310_v34, %v302_v22 }
  0x81   : > { %v428_v35 = vsub.s32 %v420_v19, %v412_v26  ;;  %v436_v36 = vshrl.u32 %v412_v26, 15  ;;  %v285_v37 = vxor.u32 %v277_v43, %v269_v5 }
  0x82   : > { %v379_v38 = vxor.u32 %v371_v30, %v363_v29  ;;  %v334_v39 = vsub.s32 %v326_v42, %v318_v32  ;;  %v342_v40 = vshrl.u32 %v318_v32, 5  ;;  %v358_v41 = vsub.s32 %v286_v21, %v318_v32 }
  0x83   : > { %v444_v44 = vxor.u32 %v436_v36, %v428_v35  ;;  %v301_v45 = vsub.s32 %v293_v28, %v285_v37  ;;  %v309_v46 = vshll.u32 %v285_v37, 16  ;;  %v325_v47 = vsub.s32 %v253_v20, %v285_v37 }
  0x84   : > { %v395_v48 = vsub.s32 %v387_v31, %v379_v38  ;;  %v403_v49 = vshll.u32 %v379_v38, 10  ;;  %v419_v52 = vsub.s32 %v347_v51, %v379_v38  ;;  %v350_v53 = vxor.u32 %v342_v40, %v334_v39 }
  0x85   : > { %v452_v54 = vand.u32 8388607, %v444_v44  ;;  %v317_v55 = vxor.u32 %v309_v46, %v301_v45  ;;  %v504_v45 = vld [vmem:[%s913_s6 + $0x8] sm:$0xff] }
  0x86   : > { %v411_v56 = vxor.u32 %v403_v49, %v395_v48  ;;  %v366_v57 = vsub.s32 %v358_v41, %v350_v53  ;;  %v374_v58 = vshrl.u32 %v350_v53, 3  ;;  %v390_v59 = vsub.s32 %v318_v32, %v350_v53  ;;  %v503_v32 = vld [vmem:[%s913_s6] sm:$0xff] }
  0x87   : > { %v460_v60 = vcvt.s32.f32 %v452_v54  ;;  %v333_v61 = vsub.s32 %v325_v47, %v317_v55  ;;  %v341_v62 = vshrl.u32 %v317_v55, 5  ;;  %v357_v24 = vsub.s32 %v285_v37, %v317_v55  ;;  %v505_v37 = vld [vmem:[%s913_s6 + $0x10] sm:$0xff] }
  0x88   : > { %v427_v63 = vsub.s32 %v419_v52, %v411_v56  ;;  %v435_v0 = vshrl.u32 %v411_v56, 15  ;;  %v382_v1 = vxor.u32 %v374_v58, %v366_v57  ;;  %v508_v52 = vld [vmem:[%s913_s6 + $0x28] sm:$0xff]  ;;  %v510_v58 = vld [vmem:[%s913_s6 + $0x38] sm:$0xff] }
  0x89   : > { %v468_v2 = vmul.f32 1.1920929e-07, %v460_v60  ;;  %v349_v4 = vxor.u32 %v341_v62, %v333_v61  ;;  %v509_v62 = vld [vmem:[%s913_s6 + $0x30] sm:$0xff] }
  0x8a   : > { %v443_v6 = vxor.u32 %v435_v0, %v427_v63  ;;  %v398_v7 = vsub.s32 %v390_v59, %v382_v1  ;;  %v406_v8 = vshll.u32 %v382_v1, 10  ;;  %v422_v9 = vsub.s32 %v350_v53, %v382_v1 }
  0x8b   : > { %481 = vmax.xlane.f32.xlu1 %v468_v2  ;;  %v365_v10 = vsub.s32 %v357_v24, %v349_v4  ;;  %v373_v25 = vshrl.u32 %v349_v4, 3  ;;  %v389_v3 = vsub.s32 %v317_v55, %v349_v4 }
  0x8c   : > { %v451_v11 = vand.u32 8388607, %v443_v6  ;;  %v414_v12 = vxor.u32 %v406_v8, %v398_v7 }
  0x8d   : > { %v381_v13 = vxor.u32 %v373_v25, %v365_v10 }
  0x8e   : > { %v459_v14 = vcvt.s32.f32 %v451_v11  ;;  %v430_v50 = vsub.s32 %v422_v9, %v414_v12  ;;  %v438_v15 = vshrl.u32 %v414_v12, 15 }
  0x8f   : > { %v397_v21 = vsub.s32 %v389_v3, %v381_v13  ;;  %v405_v17 = vshll.u32 %v381_v13, 10  ;;  %v421_v18 = vsub.s32 %v349_v4, %v381_v13 }
  0x90   : > { %v467_v19 = vmul.f32 1.1920929e-07, %v459_v14  ;;  %v446_v20 = vxor.u32 %v438_v15, %v430_v50 }
  0x91   : > { %v413_v51 = vxor.u32 %v405_v17, %v397_v21 }
  0x92   : > { %479 = vmax.xlane.f32.xlu0 %v467_v19  ;;  %v454_v22 = vand.u32 8388607, %v446_v20 }
  0x93   : > { %v429_v34 = vsub.s32 %v421_v18, %v413_v51  ;;  %v437_v42 = vshrl.u32 %v413_v51, 15 }
  0x94   : > { %v462_v26 = vcvt.s32.f32 %v454_v22 }
  0x95   : > { %v445_v5 = vxor.u32 %v437_v42, %v429_v34 }
  0x96   : > { %v470_v43 = vmul.f32 1.1920929e-07, %v462_v26 }
  0x97   : > { %v453_v28 = vand.u32 8388607, %v445_v5 }
  0x98   : > { %485 = vmax.xlane.f32.xlu1 %v470_v43 }
  0x99   : > { %v461_v29 = vcvt.s32.f32 %v453_v28 }
  0x9b   : > { %v469_v30 = vmul.f32 1.1920929e-07, %v461_v29 }
  0x9d   : > { %483 = vmax.xlane.f32.xlu0 %v469_v30 }
  0xfb   : > { %v472_v31 = vpop.xlane.xlu0 %471 }
  0xfc   : > { %v487_v35 = vmin.f32 %v472_v31, 0.5 }
  0xfd   : > { %v476_v36 = vpop.xlane.xlu1 %475 }
  0xfe   : > { %v489_v38 = vmin.f32 %v476_v36, 0.5  ;;  %vm495_vm0 = vcmp.ge.f32.partialorder %v982_v16, %v487_v35  ;;  %v506_v16 = vld [vmem:[%s913_s6 + $0x18] sm:$0xff] }
  0xff   : > { %v511_v39 = vsel %vm495_vm0, %v503_v32, 0.0 }
 0x100   : > { %vm497_vm1 = vcmp.ge.f32.partialorder %v985_v23, %v489_v38  ;;  %519 = vst [vmem:[%s1009_s5] sm:$0xff] %v511_v39  ;;  %v474_v40 = vpop.xlane.xlu0 %473 }
 0x101   : > { %v513_v41 = vsel %vm497_vm1, %v505_v37, 0.0  ;;  %v478_v44 = vpop.xlane.xlu1 %477  ;;  %v488_v46 = vmin.f32 %v474_v40, 0.5 }
 0x102   : > { %521 = vst [vmem:[%s1009_s5 + $0x10] sm:$0xff] %v513_v41  ;;  %v490_v47 = vmin.f32 %v478_v44, 0.5 }
 0x103   : > { %vm496_vm2 = vcmp.ge.f32.partialorder %v994_v33, %v488_v46  ;;  %v507_v33 = vld [vmem:[%s913_s6 + $0x20] sm:$0xff] }
 0x104   : > { %vm498_vm3 = vcmp.ge.f32.partialorder %v989_v27, %v490_v47  ;;  %v512_v23 = vsel %vm496_vm2, %v504_v45, 0.0 }
 0x105   : > { %v514_v48 = vsel %vm498_vm3, %v506_v16, 0.0  ;;  %520 = vst [vmem:[%s1009_s5 + $0x8] sm:$0xff] %v512_v23 }
 0x106   : > { %522 = vst [vmem:[%s1009_s5 + $0x18] sm:$0xff] %v514_v48 }
 0x118   : > { %v482_v49 = vpop.xlane.xlu1 %481 }
 0x119   : > { %v492_v53 = vmin.f32 %v482_v49, 0.5 }
 0x11b   : > { %vm500_vm4 = vcmp.ge.f32.partialorder %v468_v2, %v492_v53 }
 0x11c   : > { %v516_v54 = vsel %vm500_vm4, %v508_v52, 0.0 }
 0x11d   : > { %524 = vst [vmem:[%s1009_s5 + $0x28] sm:$0xff] %v516_v54 }
 0x11f   : > { %v480_v55 = vpop.xlane.xlu0 %479 }
 0x120   : > { %v491_v56 = vmin.f32 %v480_v55, 0.5 }
 0x122   : > { %vm499_vm5 = vcmp.ge.f32.partialorder %v467_v19, %v491_v56 }
 0x123   : > { %v515_v27 = vsel %vm499_vm5, %v507_v33, 0.0 }
 0x124   : > { %523 = vst [vmem:[%s1009_s5 + $0x20] sm:$0xff] %v515_v27 }
 0x125   : > { %v486_v57 = vpop.xlane.xlu1 %485 }
 0x126   : > { %v494_v59 = vmin.f32 %v486_v57, 0.5 }
 0x128   : > { %vm502_vm6 = vcmp.ge.f32.partialorder %v470_v43, %v494_v59 }
 0x129   : > { %v518_v60 = vsel %vm502_vm6, %v510_v58, 0.0 }
 0x12a   : > { %526 = vst [vmem:[%s1009_s5 + $0x38] sm:$0xff] %v518_v60  ;;  %v484_v61 = vpop.xlane.xlu0 %483 }
 0x12b   : > { %v493_v24 = vmin.f32 %v484_v61, 0.5 }
 0x12d   : > { %vm501_vm7 = vcmp.ge.f32.partialorder %v469_v30, %v493_v24 }
 0x12e   : > { %v517_v63 = vsel %vm501_vm7, %v509_v62, 0.0 }
 0x12f   : > { %525 = vst [vmem:[%s1009_s5 + $0x30] sm:$0xff] %v517_v63 }
 0x130   : > { %724 = shalt.err (!%p721_p2)
}
 0x131   : > { %s725_s25 = scalar_lea.hbm %s1033_s15, 1024  ;;  %s729_s30 = scalar_lea.hbm %s1080_s2, 2048 }
 0x132   : > { %p726_p4 = scmp.ne.s32.totalorder %s1033_s15, %s725_s25  ;;  %p730_p9 = scmp.lt.u32.totalorder %s1033_s15, %s1080_s2 }
 0x133   : > { %p731_p1 = scmp.lt.u32.totalorder %s729_s30, %s725_s25  ;;  %p733_p6 = scmp.lt.u32.totalorder %s725_s25, %s1033_s15 }
 0x134   : > { %p727_p5 = pnand %p726_p4, %p1087_p11 }
 0x135   : > { %p732_p3 = por %p731_p1, %p730_p9 }
 0x136   : > { %p728_p7 = pneg %p727_p5 }
 0x137   : > { %p734_p12 = por %p733_p6, %p732_p3 }
 0x139   : > { %p735_p13 = pnand %p734_p12, %p728_p7 }
 0x13b   : > { %738 = shalt.err (!%p735_p13)
}
 0x13c   : > { %s783_s3 = smov 128   ;;  %s784_s21 = smov 8  }
 0x13d   : > { %633 = dma.vmem_to_hbm [thread:$0]  (%p1087_p11), %s1027_s7, 1024, %s1033_s15, %s528_s17, %s783_s3, %s783_s3, %s784_s21  }
 0x13e PF: > { %s556_s4 = sand.u32 1, %s765_s11   ;;  %p1088_p8 = scmp.ne.s32.totalorder %s1085_s23, 0 }
 0x13f   : > { %p1089_p10 = scmp.ge.s32.totalorder %s777_s14, 2  ;;  %s557_s5 = scalar_lea.sflag [#allocation6], %s556_s4 }
 0x141   : > { %p640_p0 = pnand %p1089_p10, %p1088_p8 }
 0x143   : > { %760 = dma.done.wait (!%p640_p0), %s557_s5, 1024  }
 0x144   : > { %762 = vsyncadd (!%p640_p0), %s557_s5, 4294966272  ;;  %p16_p2 = scmp.ge.s32.totalorder %s828_s16, 4   ;;  %s1090_s11 = smov %s769_s12 }
 0x145   : > { %s1091_s12 = smov %s773_s13  ;;  %s1092_s13 = smov %s840_s19 }
 0x146   : > { %s1093_s14 = smov %s828_s16  ;;  %18 = sbr.rel (!%p16_p2) target bundleno = 7 (0x7), region = 69 }
 0x14d   :  { %562 = vsyncpa [#allocation5], 1 }
 0x14e   :  { %564 = vsyncpa [#allocation5 + $0x1], 1 }
 0x14f   :  { %565 = vsyncpa [#allocation6], 1 }
 0x150   :  { %567 = vsyncpa [#allocation6 + $0x1], 1 }

</bundles_post_ra>
